<compile_context>
chip_gen: v7x
topology: tpu7x:2x2x1
jax: 0.10.0
libtpu: 0.0.40
codegen_flags: <defaults>
</compile_context>

<pallas_src>
import jax
import jax.numpy as jnp
from jax import lax
from jax.experimental import pallas as pl
from jax.experimental.pallas import tpu as pltpu


# Batch tile (multiple of 8). bf16 weights are only ~65 KB and stay resident;
# double-buffered (TILE_B, D) activations + f32 intermediates at TILE_B=256 are
# well under the VMEM limit on every chip (v5e/v6e 128 MiB, v7x 64 MiB).
_TILE_B = 256


def _actor_kernel(x_ref, w1_ref, b1_ref, w2_ref, b2_ref, wh_ref, bh_ref,
                  out_ref):
    # x / weights are bf16 for the MXU; accumulate in f32.
    x = x_ref[...]

    h1 = jnp.dot(x, w1_ref[...], preferred_element_type=jnp.float32)
    h1 = jnp.maximum(h1 + b1_ref[...], 0.0)

    h2 = jnp.dot(h1.astype(jnp.bfloat16), w2_ref[...],
                 preferred_element_type=jnp.float32)
    h2 = jnp.maximum(h2 + b2_ref[...], 0.0)

    # Fused heads: columns [0, n_actions) = mean, [n_actions, 2*n_actions) = std.
    heads = jnp.dot(h2.astype(jnp.bfloat16), wh_ref[...],
                    preferred_element_type=jnp.float32) + bh_ref[...]

    n_actions = out_ref.shape[1] // 2
    col = lax.broadcasted_iota(jnp.int32, heads.shape, 1)
    # exp(clip(.)) is bounded (<= e^2), so applying it to every column and
    # selecting with `where` avoids any cross-lane slicing/concat in-kernel.
    std_branch = jnp.exp(jnp.clip(heads, -20.0, 2.0))
    out_ref[...] = jnp.where(col >= n_actions, std_branch,
                             heads).astype(out_ref.dtype)


@jax.jit
def actor_forward(state, params):
    """SAC ActorNetwork forward: returns (mean, std)."""
    w1, b1, w2, b2, wm, bm, ws, bs = params
    B, D = state.shape
    fc1 = w1.shape[1]
    fc2 = w2.shape[1]
    n_actions = wm.shape[1]
    n_out = 2 * n_actions

    # Fuse the two heads; cast matmul operands to bf16 once, in the wrapper.
    x_bf = state.astype(jnp.bfloat16)
    w1_bf = w1.astype(jnp.bfloat16)
    w2_bf = w2.astype(jnp.bfloat16)
    wh_bf = jnp.concatenate([wm, ws], axis=1).astype(jnp.bfloat16)
    bh = jnp.concatenate([bm, bs], axis=1)  # f32 (1, 2*n_actions)

    # Small batches: one full block. Large batches: tile over batch so the
    # activation DMA pipelines against MXU work and v7x can split the grid.
    tile_b = B if B <= _TILE_B else _TILE_B
    grid = (pl.cdiv(B, tile_b),)

    def resident(shape):  # weights/biases: same block every grid step
        return pl.BlockSpec(shape, lambda i, _n=len(shape): (0,) * _n)

    out = pl.pallas_call(
        _actor_kernel,
        grid=grid,
        out_shape=jax.ShapeDtypeStruct((B, n_out), jnp.float32),
        in_specs=[
            pl.BlockSpec((tile_b, D), lambda i: (i, 0)),   # state (batch-tiled)
            resident((D, fc1)),
            resident((1, fc1)),
            resident((fc1, fc2)),
            resident((1, fc2)),
            resident((fc2, n_out)),
            resident((1, n_out)),
        ],
        out_specs=pl.BlockSpec((tile_b, n_out), lambda i: (i, 0)),
        compiler_params=pltpu.CompilerParams(
            dimension_semantics=("parallel",)),
    )(x_bf, w1_bf, b1, w2_bf, b2, wh_bf, bh)

    return out[:, :n_actions], out[:, n_actions:]


def init_actor_params(key, input_dim, fc1_dims=256, fc2_dims=128, n_actions=2):
    """Kaiming-normal (fan_in, relu gain) weights, zero biases — matches
    nn.init.kaiming_normal_(w, nonlinearity='relu'); stored transposed."""
    def kaiming(k, fan_in, fan_out):
        std = (2.0 / fan_in) ** 0.5
        # PyTorch weight is (out, in); we store (in, out) = its transpose.
        return (jax.random.normal(k, (fan_out, fan_in), jnp.float32) * std).T

    k1, k2, k3, k4 = jax.random.split(key, 4)
    w1 = kaiming(k1, input_dim, fc1_dims)
    b1 = jnp.zeros((1, fc1_dims), jnp.float32)
    w2 = kaiming(k2, fc1_dims, fc2_dims)
    b2 = jnp.zeros((1, fc2_dims), jnp.float32)
    wm = kaiming(k3, fc2_dims, n_actions)
    bm = jnp.zeros((1, n_actions), jnp.float32)
    ws = kaiming(k4, fc2_dims, n_actions)
    bs = jnp.zeros((1, n_actions), jnp.float32)
    return (w1, b1, w2, b2, wm, bm, ws, bs)


def actor_forward_ref(state, params):
    """Pure-JAX f32 reference for the correctness check."""
    w1, b1, w2, b2, wm, bm, ws, bs = params
    h1 = jnp.maximum(state @ w1 + b1, 0.0)
    h2 = jnp.maximum(h1 @ w2 + b2, 0.0)
    mean = h2 @ wm + bm
    log_std = jnp.clip(h2 @ ws + bs, -20.0, 2.0)
    return mean, jnp.exp(log_std)


if __name__ == "__main__":
    key = jax.random.PRNGKey(0)
    k_param, k_state, k_state2 = jax.random.split(key, 3)

    input_dim = 8            # input_dims = (8,)
    n_actions = 2
    params = init_actor_params(k_param, input_dim,
                               fc1_dims=256, fc2_dims=128, n_actions=n_actions)

    # Small batch (single-block path), matches the original module's usage.
    batch = 4
    state = jax.random.normal(k_state, (batch, input_dim), jnp.float32)
    mean, std = actor_forward(state, params)
    jax.block_until_ready((mean, std))

    mean_ref, std_ref = actor_forward_ref(state, params)
    assert mean.shape == (batch, n_actions) and std.shape == (batch, n_actions)
    # bf16 matmul operands with f32 accumulation -> loosened tolerance.
    assert jnp.allclose(mean, mean_ref, atol=5e-2, rtol=5e-2)
    assert jnp.allclose(std, std_ref, atol=5e-2, rtol=5e-2)

    # Larger batch exercises the batch-tiled / pipelined grid path (2 tiles).
    state2 = jax.random.normal(k_state2, (512, input_dim), jnp.float32)
    mean2, std2 = actor_forward(state2, params)
    jax.block_until_ready((mean2, std2))
    mean2_ref, std2_ref = actor_forward_ref(state2, params)
    assert jnp.allclose(mean2, mean2_ref, atol=5e-2, rtol=5e-2)
    assert jnp.allclose(std2, std2_ref, atol=5e-2, rtol=5e-2)

    print("KERNEL_OK")
</pallas_src>

<mosaic_0001>
module attributes {stable_mosaic.version = 11 : i64} {
  func.func @_actor_kernel(%arg0: i32, %arg1: memref<4x8xbf16, #tpu.memory_space<vmem>>, %arg2: memref<8x256xbf16, #tpu.memory_space<vmem>>, %arg3: memref<1x256xf32, #tpu.memory_space<vmem>>, %arg4: memref<256x128xbf16, #tpu.memory_space<vmem>>, %arg5: memref<1x128xf32, #tpu.memory_space<vmem>>, %arg6: memref<128x4xbf16, #tpu.memory_space<vmem>>, %arg7: memref<1x4xf32, #tpu.memory_space<vmem>>, %arg8: memref<4x4xf32, #tpu.memory_space<vmem>>) attributes {dimension_semantics = [#tpu.dimension_semantics<parallel>], iteration_bounds = array<i64: 1>, scalar_prefetch = 0 : i64, scratch_operands = 0 : i64, tpu.core_type = #tpu.core_type<tc>, window_params = [{transform_indices = @transform_0, window_bounds = array<i64: 4, 8>}, {pipeline_mode = #tpu.pipeline_mode<synchronous>, transform_indices = @transform_1, window_bounds = array<i64: 8, 256>}, {pipeline_mode = #tpu.pipeline_mode<synchronous>, transform_indices = @transform_2, window_bounds = array<i64: 1, 256>}, {pipeline_mode = #tpu.pipeline_mode<synchronous>, transform_indices = @transform_3, window_bounds = array<i64: 256, 128>}, {pipeline_mode = #tpu.pipeline_mode<synchronous>, transform_indices = @transform_4, window_bounds = array<i64: 1, 128>}, {pipeline_mode = #tpu.pipeline_mode<synchronous>, transform_indices = @transform_5, window_bounds = array<i64: 128, 4>}, {pipeline_mode = #tpu.pipeline_mode<synchronous>, transform_indices = @transform_6, window_bounds = array<i64: 1, 4>}, {transform_indices = @transform_7, window_bounds = array<i64: 4, 4>}]} {
    %c0 = arith.constant 0 : index
    %c0_0 = arith.constant 0 : index
    %0 = vector.load %arg1[%c0, %c0_0] : memref<4x8xbf16, #tpu.memory_space<vmem>>, vector<4x8xbf16>
    %c0_1 = arith.constant 0 : index
    %c0_2 = arith.constant 0 : index
    %1 = vector.load %arg2[%c0_1, %c0_2] : memref<8x256xbf16, #tpu.memory_space<vmem>>, vector<8x256xbf16>
    %cst = arith.constant dense<0.000000e+00> : vector<4x256xf32>
    %2 = tpu.matmul %0, %1, %cst {dimension_numbers = #tpu.dot_dimension_numbers<[1], [0], [0], [1], [0, 0, 1, 1], [], []>} : vector<4x8xbf16>, vector<8x256xbf16>, vector<4x256xf32> -> vector<4x256xf32>
    %c0_3 = arith.constant 0 : index
    %c0_4 = arith.constant 0 : index
    %3 = vector.load %arg3[%c0_3, %c0_4] : memref<1x256xf32, #tpu.memory_space<vmem>>, vector<1x256xf32>
    %4 = vector.broadcast %3 : vector<1x256xf32> to vector<4x256xf32>
    %5 = arith.addf %2, %4 : vector<4x256xf32>
    %cst_5 = arith.constant 0.000000e+00 : f32
    %6 = vector.broadcast %cst_5 : f32 to vector<4x256xf32>
    %7 = arith.maximumf %5, %6 : vector<4x256xf32>
    %8 = arith.truncf %7 : vector<4x256xf32> to vector<4x256xbf16>
    %c0_6 = arith.constant 0 : index
    %c0_7 = arith.constant 0 : index
    %9 = vector.load %arg4[%c0_6, %c0_7] : memref<256x128xbf16, #tpu.memory_space<vmem>>, vector<256x128xbf16>
    %cst_8 = arith.constant dense<0.000000e+00> : vector<4x128xf32>
    %10 = tpu.matmul %8, %9, %cst_8 {dimension_numbers = #tpu.dot_dimension_numbers<[1], [0], [0], [1], [0, 0, 1, 1], [], []>} : vector<4x256xbf16>, vector<256x128xbf16>, vector<4x128xf32> -> vector<4x128xf32>
    %c0_9 = arith.constant 0 : index
    %c0_10 = arith.constant 0 : index
    %11 = vector.load %arg5[%c0_9, %c0_10] : memref<1x128xf32, #tpu.memory_space<vmem>>, vector<1x128xf32>
    %12 = vector.broadcast %11 : vector<1x128xf32> to vector<4x128xf32>
    %13 = arith.addf %10, %12 : vector<4x128xf32>
    %cst_11 = arith.constant 0.000000e+00 : f32
    %14 = vector.broadcast %cst_11 : f32 to vector<4x128xf32>
    %15 = arith.maximumf %13, %14 : vector<4x128xf32>
    %16 = arith.truncf %15 : vector<4x128xf32> to vector<4x128xbf16>
    %c0_12 = arith.constant 0 : index
    %c0_13 = arith.constant 0 : index
    %17 = vector.load %arg6[%c0_12, %c0_13] : memref<128x4xbf16, #tpu.memory_space<vmem>>, vector<128x4xbf16>
    %cst_14 = arith.constant dense<0.000000e+00> : vector<4x4xf32>
    %18 = tpu.matmul %16, %17, %cst_14 {dimension_numbers = #tpu.dot_dimension_numbers<[1], [0], [0], [1], [0, 0, 1, 1], [], []>} : vector<4x128xbf16>, vector<128x4xbf16>, vector<4x4xf32> -> vector<4x4xf32>
    %c0_15 = arith.constant 0 : index
    %c0_16 = arith.constant 0 : index
    %19 = vector.load %arg7[%c0_15, %c0_16] : memref<1x4xf32, #tpu.memory_space<vmem>>, vector<1x4xf32>
    %20 = vector.broadcast %19 : vector<1x4xf32> to vector<4x4xf32>
    %21 = arith.addf %18, %20 : vector<4x4xf32>
    %22 = tpu.iota {dimensions = array<i32: 1>} : vector<4x4xi32>
    %cst_17 = arith.constant -2.000000e+01 : f32
    %cst_18 = arith.constant 2.000000e+00 : f32
    %23 = vector.broadcast %cst_17 : f32 to vector<4x4xf32>
    %24 = arith.maximumf %23, %21 : vector<4x4xf32>
    %25 = vector.broadcast %cst_18 : f32 to vector<4x4xf32>
    %26 = arith.minimumf %25, %24 : vector<4x4xf32>
    %27 = math.exp %26 : vector<4x4xf32>
    %c2_i32 = arith.constant 2 : i32
    %28 = vector.broadcast %c2_i32 : i32 to vector<4x4xi32>
    %29 = arith.cmpi sge, %22, %28 : vector<4x4xi32>
    %30 = arith.select %29, %27, %21 : vector<4x4xi1>, vector<4x4xf32>
    %c0_19 = arith.constant 0 : index
    %c0_20 = arith.constant 0 : index
    %31 = vector.load %arg8[%c0_19, %c0_20] : memref<4x4xf32, #tpu.memory_space<vmem>>, vector<4x4xf32>
    tpu.vector_store %arg8[%c0_19, %c0_20], %30 {strides = array<i32>} : memref<4x4xf32, #tpu.memory_space<vmem>>, vector<4x4xf32>,
    return
  }
  func.func @transform_0(%arg0: i32) -> (i32, i32) {
    %c0_i32 = arith.constant 0 : i32
    %c0_i32_0 = arith.constant 0 : i32
    return %arg0, %c0_i32 : i32, i32
  }
  func.func @transform_1(%arg0: i32) -> (i32, i32) {
    %c0_i32 = arith.constant 0 : i32
    %c0_i32_0 = arith.constant 0 : i32
    %c0_i32_1 = arith.constant 0 : i32
    return %c0_i32, %c0_i32_0 : i32, i32
  }
  func.func @transform_2(%arg0: i32) -> (i32, i32) {
    %c0_i32 = arith.constant 0 : i32
    %c0_i32_0 = arith.constant 0 : i32
    %c0_i32_1 = arith.constant 0 : i32
    return %c0_i32, %c0_i32_0 : i32, i32
  }
  func.func @transform_3(%arg0: i32) -> (i32, i32) {
    %c0_i32 = arith.constant 0 : i32
    %c0_i32_0 = arith.constant 0 : i32
    %c0_i32_1 = arith.constant 0 : i32
    return %c0_i32, %c0_i32_0 : i32, i32
  }
  func.func @transform_4(%arg0: i32) -> (i32, i32) {
    %c0_i32 = arith.constant 0 : i32
    %c0_i32_0 = arith.constant 0 : i32
    %c0_i32_1 = arith.constant 0 : i32
    return %c0_i32, %c0_i32_0 : i32, i32
  }
  func.func @transform_5(%arg0: i32) -> (i32, i32) {
    %c0_i32 = arith.constant 0 : i32
    %c0_i32_0 = arith.constant 0 : i32
    %c0_i32_1 = arith.constant 0 : i32
    return %c0_i32, %c0_i32_0 : i32, i32
  }
  func.func @transform_6(%arg0: i32) -> (i32, i32) {
    %c0_i32 = arith.constant 0 : i32
    %c0_i32_0 = arith.constant 0 : i32
    %c0_i32_1 = arith.constant 0 : i32
    return %c0_i32, %c0_i32_0 : i32, i32
  }
  func.func @transform_7(%arg0: i32) -> (i32, i32) {
    %c0_i32 = arith.constant 0 : i32
    %c0_i32_0 = arith.constant 0 : i32
    return %arg0, %c0_i32 : i32, i32
  }
}

</mosaic_0001>

<bundles_post_ra>
// kernel: actor_forward.1
= control target key start
LH: loop header
LB: loop body
LE: loop exit
PB: predicated region body
PF: predicated region fallthrough
CT: control target
= control target key end

     0   :  { %vm50_vm0 = vcmask 1043456   ;;  %v516_v1 = vmov 0   ;;  %vm46_vm1 = vcmask 64512   ;;  %v517_v22 = vmov 0.0   ;;  %s649_s1 = inlined_call_operand.vmem [shape: bf16[8,256], index: 1, kind: input, shape index: {}]   ;;  %s650_s0 = inlined_call_operand.vmem [shape: bf16[4,8], index: 0, kind: input, shape index: {}]   ;;  %s651_s3 = inlined_call_operand.vmem [shape: bf16[256,128], index: 3, kind: input, shape index: {}]   ;;  %s652_s5 = inlined_call_operand.vmem [shape: bf16[128,4], index: 5, kind: input, shape index: {}]   ;;  %s653_s2 = inlined_call_operand.vmem [shape: f32[1,256], index: 2, kind: input, shape index: {}]   ;;  %s654_s4 = inlined_call_operand.vmem [shape: f32[1,128], index: 4, kind: input, shape index: {}]   ;;  %s655_s6 = inlined_call_operand.vmem [shape: f32[1,4], index: 6, kind: input, shape index: {}]   ;;  %s656_s7 = inlined_call_operand.vmem [shape: f32[4,4], index: 7, kind: output, shape index: {}]  }
   0x1   :  { %v28_v0 = vld [vmem:[%s649_s1] sm:$0xff]  ;;  %89 = vmatprep.mubr.bf16.mxu0 %v516_v1  ;;  %v492_v8 = vld [vmem:[%s651_s3 + $0x48] sm:$0xff]   ;;  %v494_v10 = vld [vmem:[%s651_s3 + $0x50] sm:$0xff]   ;;  %v31_v29 = vlaneseq  ;;  %vm518_vm2 = vmmov 0   ;;  %vm398_vm4 = vcmask 27648  }
   0x2   :  { %v405_v2 = vcombine.high %v28_v0, %v28_v0  ;;  %v404_v3 = vcombine.low %v28_v0, %v28_v0  ;;  %v490_v4 = vld [vmem:[%s651_s3 + $0x40] sm:$0xff]   ;;  %v493_v9 = vld [vmem:[%s651_s3 + $0x8] sm:$0xff]   ;;  %v495_v11 = vld [vmem:[%s651_s3 + $0x10] sm:$0xff]  }
   0x3   :  { %v27_v5 = vld [vmem:[%s650_s0] sm:$0x3]  ;;  %434 = vmatprep.subr.bf16.mxu1 %v490_v4  ;;  %v496_v12 = vld [vmem:[%s651_s3 + $0x58] sm:$0xff]   ;;  %v500_v16 = vld [vmem:[%s651_s3 + $0x68] sm:$0xff]   ;;  %v32_v30 = vshrl.u32 %v31_v29, 7 }
   0x4   :  { %v491_v6 = vld [vmem:[%s651_s3] sm:$0xff]   ;;  %406 = vmatprep.subr.msk.bf16.mxu0 %vm50_vm0, %v405_v2  ;;  %v52_v7 = vsel %vm50_vm0, %v404_v3, 0  ;;  %v497_v13 = vld [vmem:[%s651_s3 + $0x18] sm:$0xff]   ;;  %v501_v17 = vld [vmem:[%s651_s3 + $0x28] sm:$0xff]   ;;  %v391_v2 = vand.u32 127, %v31_v29 }
   0x5   :  { %58 = vmatpush1.bf16.msra.mxu0 %v52_v7  ;;  %435 = vmatpush3.bf16.msra.mxu1 %v491_v6  ;;  %v498_v14 = vld [vmem:[%s651_s3 + $0x60] sm:$0xff]   ;;  %v502_v18 = vld [vmem:[%s651_s3 + $0x70] sm:$0xff]   ;;  %v504_v20 = vld [vmem:[%s651_s3 + $0x78] sm:$0xff]   ;;  %v33_v31 = vsub.s32 0, %v32_v30  ;;  %v37_v33 = vsub.s32 1, %v32_v30 }
   0x6   :  { %436 = vmatprep.subr.bf16.mxu1 %v492_v8  ;;  %v499_v15 = vld [vmem:[%s651_s3 + $0x20] sm:$0xff]   ;;  %v503_v19 = vld [vmem:[%s651_s3 + $0x30] sm:$0xff]   ;;  %v505_v21 = vld [vmem:[%s651_s3 + $0x38] sm:$0xff]   ;;  %465 = vmatprep.subr.bf16.mxu0 %v517_v22  ;;  %vm396_vm3 = vcmp.ge.s32.totalorder %v391_v2, 2 }
   0x7   :  { %v506_v23 = vld [vmem:[%s652_s5] sm:$0xff]   ;;  %v507_v24 = vld [vmem:[%s652_s5 + $0x8] sm:$0xff]   ;;  %v508_v25 = vld [vmem:[%s652_s5 + $0x10] sm:$0xff]  }
   0x8   :  { %407 = vmatmul.mubr.msk.bf16.vlgmr.msra.gmra.mrb[0].mxu0 %vm46_vm1, %v27_v5  ;;  %v509_v26 = vld [vmem:[%s652_s5 + $0x18] sm:$0xff]   ;;  %v510_v27 = vld [vmem:[%s652_s5 + $0x20] sm:$0xff]   ;;  %v511_v28 = vld [vmem:[%s652_s5 + $0x28] sm:$0xff]  }
   0x9   :  { %437 = vmatpush3.bf16.msra.mxu1 %v493_v9  ;;  %466 = vmatpush3.bf16.msra.mxu0 %v506_v23  ;;  %v29_v32 = vld [vmem:[%s653_s2] sm:$0x3]  ;;  %v512_v46 = vld [vmem:[%s652_s5 + $0x30] sm:$0xff]   ;;  %v513_v47 = vld [vmem:[%s652_s5 + $0x38] sm:$0xff]  }
   0xa   :  { %438 = vmatprep.subr.bf16.mxu1 %v494_v10  ;;  %467 = vmatprep.subr.bf16.mxu0 %v517_v22  ;;  %v34_v34 = vrot.slane %v29_v32, %v33_v31  ;;  %v38_v35 = vrot.slane %v29_v32, %v37_v33  ;;  %v408_v49 = vld [vmem:[%s654_s4] ss:$0 sm:$0xff] }
   0xb   :  { %481 = vmatprep.mubr.msk.bf16.mxu0 %vm518_vm2, %v517_v22  ;;  %v425_v57 = vld [vmem:[%s655_s6] ss:$0 sm:$0xff] }
   0xd   :  { %439 = vmatpush3.bf16.msra.mxu1 %v495_v11  ;;  %468 = vmatpush3.bf16.msra.mxu0 %v507_v24 }
   0xe   :  { %440 = vmatprep.subr.bf16.mxu1 %v496_v12  ;;  %469 = vmatprep.subr.bf16.mxu0 %v517_v22 }
  0x11   :  { %441 = vmatpush3.bf16.msra.mxu1 %v497_v13  ;;  %470 = vmatpush3.bf16.msra.mxu0 %v508_v25 }
  0x12   :  { %442 = vmatprep.subr.bf16.mxu1 %v498_v14  ;;  %471 = vmatprep.subr.bf16.mxu0 %v517_v22 }
  0x15   :  { %443 = vmatpush3.bf16.msra.mxu1 %v499_v15  ;;  %472 = vmatpush3.bf16.msra.mxu0 %v509_v26 }
  0x16   :  { %444 = vmatprep.subr.bf16.mxu1 %v500_v16  ;;  %473 = vmatprep.subr.bf16.mxu0 %v517_v22 }
  0x19   :  { %445 = vmatpush3.bf16.msra.mxu1 %v501_v17  ;;  %474 = vmatpush3.bf16.msra.mxu0 %v510_v27 }
  0x1a   :  { %446 = vmatprep.subr.bf16.mxu1 %v502_v18  ;;  %475 = vmatprep.subr.bf16.mxu0 %v517_v22 }
  0x1d   :  { %447 = vmatpush3.bf16.msra.mxu1 %v503_v19  ;;  %476 = vmatpush3.bf16.msra.mxu0 %v511_v28 }
  0x1e   :  { %448 = vmatprep.subr.bf16.mxu1 %v504_v20  ;;  %477 = vmatprep.subr.bf16.mxu0 %v517_v22 }
  0x21   :  { %449 = vmatpush3.bf16.msra.mxu1 %v505_v21  ;;  %478 = vmatpush3.bf16.msra.mxu0 %v512_v46 }
  0x22   :  { %479 = vmatprep.subr.bf16.mxu0 %v517_v22 }
  0x25   :  { %480 = vmatpush3.bf16.msra.mxu0 %v513_v47 }
  0xdb   :  { %v91_v36 = vpop.f32.mrb[0].mxu0 }
  0xdc   :  { %v92_v37 = vadd.f32 %v91_v36, %v34_v34  ;;  %v93_v38 = vpop.f32.mrb[1].mxu0 }
  0xdd   :  { %v94_v39 = vadd.f32 %v93_v38, %v38_v35  ;;  %v95_v40 = vpop.f32.mrb[2].mxu0 }
  0xde   :  { %v98_v41 = vmax.f32 %v92_v37, 0.0  ;;  %v96_v42 = vpop.f32.mrb[3].mxu0 }
  0xdf   :  { %v99_v43 = vmax.f32 %v94_v39, 0.0 }
  0xe0   :  { %v100_v45 = vpack.c.bf16 %v98_v41, %v98_v41 }
  0xe1   :  { %v101_v44 = vpack.c.bf16 %v99_v43, %v99_v43 }
  0xe3   :  { %269 = vmatprep.mubr.bf16.mxu1 %v101_v44 }
  0xe4   :  { %270 = vmatmul.mubr.bf16.vlgmr.msra.gmra.mrb[0].mxu1 %v100_v45 }
 0x1b7   :  { %v450_v48 = vpop.f32.mrb[0].mxu1 }
 0x1b8   :  { %v451_v50 = vpop.f32.mrb[1].mxu1 }
 0x1b9   :  { %v452_v51 = vadd.f32 %v451_v50, %v450_v48  ;;  %v453_v52 = vpop.f32.mrb[2].mxu1 }
 0x1ba   :  { %v454_v53 = vpop.f32.mrb[3].mxu1 }
 0x1bb   :  { %v272_v54 = vadd.f32 %v452_v51, %v408_v49 }
 0x1bd   :  { %v277_v55 = vmax.f32 %v272_v54, 0.0 }
 0x1bf   :  { %v278_v56 = vpack.c.bf16 %v277_v55, %v277_v55 }
 0x1c1   :  { %482 = vmatmul.mubr.bf16.vlgmr.msra.gmra.mrb[4].mxu0 %v278_v56 }
 0x294   :  { %v384_v58 = vpop.f32.mrb[4].mxu0 }
 0x295   :  { %v385_v59 = vadd.f32 %v425_v57, %v384_v58  ;;  %v483_v60 = vpop.f32.mrb[5].mxu0 }
 0x296   :  { %v387_v61 = vpop.f32.mrb[6].mxu0 }
 0x297   :  { %v392_v62 = vmax.f32 %v385_v59, -20.0  ;;  %v484_v63 = vpop.f32.mrb[7].mxu0 }
 0x299   :  { %v393_v0 = vmin.f32 %v392_v62, 2.0 }
 0x29b   :  { %v394_v1 = vmul.f32 1.442695, %v393_v0 }
 0x29d   :  { %514 = vpow2.f32 %v394_v1 }
 0x2a7   :  { %v515_v3 = vpop.eup %514 }
 0x2a8   :  { %v397_v4 = vsel %vm396_vm3, %v515_v3, %v385_v59 }
 0x2a9   :  { %399 = vst.msk [vmem:[%s656_s7] sm:$0xf] %vm398_vm4, %v397_v4 }

</bundles_post_ra>
